<compile_context>
chip_gen: v7x
topology: tpu7x:2x2x1
jax: 0.10.0
libtpu: 0.0.40
codegen_flags: <defaults>
</compile_context>

<pallas_src>
import jax
import jax.numpy as jnp
from jax import lax
from jax.experimental import pallas as pl
from jax.experimental.pallas import tpu as pltpu


def _ffnn_logsoftmax_kernel(x_ref, wt_ref, b_ref, o_ref, acc_ref):
    # x_ref: [TB, TK], wt_ref: [C, TK] (lane-dense), b_ref: [1, C],
    # o_ref: [TB, C], acc_ref: [TB, C] f32 scratch.
    k = pl.program_id(1)

    @pl.when(k == 0)
    def _init():
        acc_ref[...] = jnp.zeros_like(acc_ref)

    # Contract the TK axes: [TB, TK] x [C, TK] -> [TB, C], f32 accumulate on the MXU.
    acc_ref[...] += lax.dot_general(
        x_ref[...], wt_ref[...],
        dimension_numbers=(((1,), (1,)), ((), ())),
        preferred_element_type=jnp.float32)

    @pl.when(k == pl.num_programs(1) - 1)
    def _finalize():
        # Bias add + numerically-stable log-softmax, once per output tile, in f32.
        logits = acc_ref[...] + b_ref[...]
        m = jnp.max(logits, axis=-1, keepdims=True)
        shifted = logits - m
        lse = jnp.log(jnp.sum(jnp.exp(shifted), axis=-1, keepdims=True))
        o_ref[...] = (shifted - lse).astype(o_ref.dtype)


def _largest_div_mult_128(total, cap):
    """Largest multiple of 128 that divides `total` and is <= cap (>=128)."""
    best = 128
    t = 128
    while t <= min(total, cap):
        if total % t == 0:
            best = t
        t += 128
    return best


def _tpu_generation_info():
    """(vmem_capacity_bytes, num_tensorcores_per_chip) with safe fallbacks."""
    vmem_cap = 128 * 1024 * 1024
    num_tc = 1
    try:
        vmem_cap = int(pltpu.get_tpu_info().vmem_capacity_bytes)
    except Exception:
        pass
    try:
        kind = jax.devices()[0].device_kind.lower()
        if "v7" in kind:
            num_tc = 2
    except Exception:
        pass
    # 64 MiB per-core VMEM is the v7x signature (2 TensorCores per chip).
    if vmem_cap <= 80 * 1024 * 1024:
        num_tc = max(num_tc, 2)
    return vmem_cap, num_tc


def glibert_ffnn_nocls_forward(last_hidden_state, weight, bias, *,
                               block_b=None, max_block_k=8192, use_bf16=False):
    """Forward pass of GliBertClassifierFFNNNoCLS (combine_SRLs=False).

    Args:
      last_hidden_state: [B, max_len, H] float32 encoder output (CLS token at pos 0).
      weight: [(max_len-1)*H, num_classes] float32 (transposed vs. torch nn.Linear).
      bias:   [num_classes] float32.
      use_bf16: cast x / W to bfloat16 at the call boundary (f32 accumulate + epilogue).
    Returns:
      [B, num_classes] float32 log-probabilities.
    """
    B, L, H = last_hidden_state.shape
    D = (L - 1) * H
    Dp = L * H                      # padded feature length (CLS rows of W are zero)
    C = weight.shape[1]
    assert weight.shape[0] == D, "weight must be [(max_len-1)*H, num_classes]"
    assert H % 128 == 0, "hidden size must be a multiple of 128 (BERT: 768)"

    in_dtype = jnp.bfloat16 if use_bf16 else jnp.float32
    sub_mult = 16 if use_bf16 else 8
    itemsize = 2 if use_bf16 else 4

    # Free contiguous-merge reshape (no HBM copy); CLS is neutralized by the zero-padded
    # first H rows of the weight, not by slicing the activations.
    x = last_hidden_state.reshape(B, Dp).astype(in_dtype)
    # One-time weight prep: zero-pad the CLS rows, then transpose to lane-dense [C, Dp].
    w_t = jnp.concatenate(
        [jnp.zeros((H, C), dtype=weight.dtype), weight], axis=0).T.astype(in_dtype)
    b2 = bias.reshape(1, C).astype(jnp.float32)

    vmem_cap, num_tc = _tpu_generation_info()
    # Per-generation VMEM request cap: leave headroom on v7x (64 MiB physical),
    # allow large tiles on v5e/v6e (128 MiB physical).
    vmem_req_cap = (36 << 20) if vmem_cap <= (80 << 20) else (96 << 20)

    # Batch tile: maximize (weight is re-streamed once per batch tile). Only on a
    # dual-TensorCore chip split into exactly 2 tiles to shard the "parallel" axis.
    if block_b is not None:
        TB = block_b
        assert B % TB == 0, "block_b must divide the batch size"
    else:
        TB = B
        if num_tc >= 2 and B % 2 == 0 and (B // 2) % sub_mult == 0:
            TB = B // 2

    c_sub = ((C + 7) // 8) * 8          # sublane padding of the (C, TK) weight block
    c_lane = ((C + 127) // 128) * 128   # lane padding of out / acc / bias blocks

    # K tile: largest multiple of 128 dividing L*H, bounded by max_block_k and the
    # double-buffered VMEM budget.
    cap_k = int(max_block_k)
    while True:
        TK = _largest_div_mult_128(Dp, cap_k)
        tile_bytes = (2 * (TB * TK * itemsize          # x, double-buffered
                           + c_sub * TK * itemsize      # W^T, double-buffered
                           + 8 * c_lane * 4             # bias
                           + max(TB, 8) * c_lane * 4)   # output
                      + max(TB, 8) * c_lane * 4)        # accumulator scratch
        if tile_bytes <= int(0.8 * vmem_req_cap) or cap_k <= 128:
            break
        cap_k //= 2

    grid = (B // TB, Dp // TK)           # reduction axis last
    vmem_limit = int(min(max(int(tile_bytes * 2.25), 8 << 20), vmem_req_cap))

    cost = pl.CostEstimate(
        flops=2 * B * Dp * C,
        transcendentals=B * C,
        bytes_accessed=itemsize * (B * Dp + Dp * C) + 4 * (B * C + C))

    return pl.pallas_call(
        _ffnn_logsoftmax_kernel,
        out_shape=jax.ShapeDtypeStruct((B, C), jnp.float32),
        grid_spec=pltpu.PrefetchScalarGridSpec(
            num_scalar_prefetch=0,
            grid=grid,
            in_specs=[
                pl.BlockSpec((TB, TK), lambda i, k: (i, k)),   # activations
                pl.BlockSpec((C, TK), lambda i, k: (0, k)),    # lane-dense W^T
                pl.BlockSpec((1, C), lambda i, k: (0, 0)),     # bias
            ],
            out_specs=pl.BlockSpec((TB, C), lambda i, k: (i, 0)),
            scratch_shapes=[pltpu.VMEM((TB, C), jnp.float32)],
        ),
        compiler_params=pltpu.CompilerParams(
            dimension_semantics=("parallel", "arbitrary"),
            vmem_limit_bytes=vmem_limit,
        ),
        cost_estimate=cost,
    )(x, w_t, b2)


if __name__ == "__main__":
    # Small, module-consistent shapes: batch=16, max_len=9 (seq-without-CLS = 8),
    # hidden=128 (stand-in for 768), num_classes=8.
    B, max_len, H, num_classes = 16, 9, 128, 8
    D = (max_len - 1) * H

    key = jax.random.PRNGKey(0)
    k_x, k_w, k_b = jax.random.split(key, 3)

    last_hidden_state = jax.random.normal(k_x, (B, max_len, H), dtype=jnp.float32)
    bound = 1.0 / (D ** 0.5)
    weight = jax.random.uniform(k_w, (D, num_classes), dtype=jnp.float32,
                                minval=-bound, maxval=bound)
    bias = jax.random.uniform(k_b, (num_classes,), dtype=jnp.float32,
                              minval=-bound, maxval=bound)

    # f32 path (exact-reference check).
    proba = glibert_ffnn_nocls_forward(last_hidden_state, weight, bias)
    proba = jax.block_until_ready(proba)

    # Reference in plain JAX (semantics of the PyTorch module).
    x_ref = last_hidden_state[:, 1:, :].reshape(B, D)
    logits_ref = x_ref @ weight + bias
    ref = jax.nn.log_softmax(logits_ref, axis=-1)
    assert proba.shape == (B, num_classes)
    assert jnp.allclose(proba, ref, atol=1e-4, rtol=1e-4), "mismatch vs reference"

    # Optional bf16-input path (f32 accumulate + epilogue); loose tolerance smoke check.
    proba_bf16 = glibert_ffnn_nocls_forward(last_hidden_state, weight, bias,
                                            use_bf16=True)
    proba_bf16 = jax.block_until_ready(proba_bf16)
    assert jnp.allclose(proba_bf16, ref, atol=5e-2), "bf16 path drifted too far"

    print("KERNEL_OK")
</pallas_src>

<mosaic_0001>
module attributes {stable_mosaic.version = 11 : i64} {
  func.func @_ffnn_logsoftmax_kernel(%arg0: i32, %arg1: i32, %arg2: memref<16x1152xf32, #tpu.memory_space<vmem>>, %arg3: memref<8x1152xf32, #tpu.memory_space<vmem>>, %arg4: memref<1x8xf32, #tpu.memory_space<vmem>>, %arg5: memref<16x8xf32, #tpu.memory_space<vmem>>, %arg6: memref<16x8xf32, #tpu.memory_space<vmem>>) attributes {dimension_semantics = [#tpu.dimension_semantics<parallel>, #tpu.dimension_semantics<arbitrary>], iteration_bounds = array<i64: 1, 1>, scalar_prefetch = 0 : i64, scratch_operands = 1 : i64, tpu.core_type = #tpu.core_type<tc>, window_params = [{transform_indices = @transform_0, window_bounds = array<i64: 16, 1152>}, {transform_indices = @transform_1, window_bounds = array<i64: 8, 1152>}, {pipeline_mode = #tpu.pipeline_mode<synchronous>, transform_indices = @transform_2, window_bounds = array<i64: 1, 8>}, {transform_indices = @transform_3, window_bounds = array<i64: 16, 8>}]} {
    %c0_i32 = arith.constant 0 : i32
    %0 = arith.cmpi eq, %arg1, %c0_i32 : i32
    %1 = arith.extui %0 : i1 to i32
    %c0_i32_0 = arith.constant 0 : i32
    %2 = arith.cmpi ne, %1, %c0_i32_0 : i32
    scf.if %2 {
      %cst_10 = arith.constant 0.000000e+00 : f32
      %12 = vector.broadcast %cst_10 : f32 to vector<16x8xf32>
      %c0_11 = arith.constant 0 : index
      %c0_12 = arith.constant 0 : index
      %13 = vector.load %arg6[%c0_11, %c0_12] : memref<16x8xf32, #tpu.memory_space<vmem>>, vector<16x8xf32>
      tpu.vector_store %arg6[%c0_11, %c0_12], %12 {strides = array<i32>} : memref<16x8xf32, #tpu.memory_space<vmem>>, vector<16x8xf32>,
    } else {
    }
    %c0 = arith.constant 0 : index
    %c0_1 = arith.constant 0 : index
    %3 = vector.load %arg6[%c0, %c0_1] : memref<16x8xf32, #tpu.memory_space<vmem>>, vector<16x8xf32>
    %c0_2 = arith.constant 0 : index
    %c0_3 = arith.constant 0 : index
    %4 = vector.load %arg2[%c0_2, %c0_3] : memref<16x1152xf32, #tpu.memory_space<vmem>>, vector<16x1152xf32>
    %c0_4 = arith.constant 0 : index
    %c0_5 = arith.constant 0 : index
    %5 = vector.load %arg3[%c0_4, %c0_5] : memref<8x1152xf32, #tpu.memory_space<vmem>>, vector<8x1152xf32>
    %cst = arith.constant dense<0.000000e+00> : vector<16x8xf32>
    %6 = tpu.matmul %4, %5, %cst {dimension_numbers = #tpu.dot_dimension_numbers<[1], [1], [0], [0], [0, 0, 1, 0], [], []>} : vector<16x1152xf32>, vector<8x1152xf32>, vector<16x8xf32> -> vector<16x8xf32>
    %7 = arith.addf %3, %6 : vector<16x8xf32>
    %c0_6 = arith.constant 0 : index
    %c0_7 = arith.constant 0 : index
    %8 = vector.load %arg6[%c0_6, %c0_7] : memref<16x8xf32, #tpu.memory_space<vmem>>, vector<16x8xf32>
    tpu.vector_store %arg6[%c0_6, %c0_7], %7 {strides = array<i32>} : memref<16x8xf32, #tpu.memory_space<vmem>>, vector<16x8xf32>,
    %c0_i32_8 = arith.constant 0 : i32
    %9 = arith.cmpi eq, %arg1, %c0_i32_8 : i32
    %10 = arith.extui %9 : i1 to i32
    %c0_i32_9 = arith.constant 0 : i32
    %11 = arith.cmpi ne, %10, %c0_i32_9 : i32
    scf.if %11 {
      %c0_10 = arith.constant 0 : index
      %c0_11 = arith.constant 0 : index
      %12 = vector.load %arg6[%c0_10, %c0_11] : memref<16x8xf32, #tpu.memory_space<vmem>>, vector<16x8xf32>
      %c0_12 = arith.constant 0 : index
      %c0_13 = arith.constant 0 : index
      %13 = vector.load %arg4[%c0_12, %c0_13] : memref<1x8xf32, #tpu.memory_space<vmem>>, vector<1x8xf32>
      %14 = vector.broadcast %13 : vector<1x8xf32> to vector<16x8xf32>
      %15 = arith.addf %12, %14 : vector<16x8xf32>
      %cst_14 = arith.constant dense<0xFF800000> : vector<16xf32>
      %16 = vector.multi_reduction <maximumf>, %15, %cst_14 [1] : vector<16x8xf32> to vector<16xf32>
      %17 = vector.shape_cast %16 : vector<16xf32> to vector<16x1xf32>
      %18 = vector.broadcast %17 : vector<16x1xf32> to vector<16x8xf32>
      %19 = arith.subf %15, %18 : vector<16x8xf32>
      %20 = math.exp %19 : vector<16x8xf32>
      %cst_15 = arith.constant dense<0.000000e+00> : vector<16xf32>
      %21 = vector.multi_reduction <add>, %20, %cst_15 [1] : vector<16x8xf32> to vector<16xf32>
      %22 = vector.shape_cast %21 : vector<16xf32> to vector<16x1xf32>
      %23 = math.log %22 : vector<16x1xf32>
      %24 = vector.broadcast %23 : vector<16x1xf32> to vector<16x8xf32>
      %25 = arith.subf %19, %24 : vector<16x8xf32>
      %c0_16 = arith.constant 0 : index
      %c0_17 = arith.constant 0 : index
      %26 = vector.load %arg5[%c0_16, %c0_17] : memref<16x8xf32, #tpu.memory_space<vmem>>, vector<16x8xf32>
      tpu.vector_store %arg5[%c0_16, %c0_17], %25 {strides = array<i32>} : memref<16x8xf32, #tpu.memory_space<vmem>>, vector<16x8xf32>,
    } else {
    }
    return
  }
  func.func @transform_0(%arg0: i32, %arg1: i32) -> (i32, i32) {
    %c0_i32 = arith.constant 0 : i32
    return %arg0, %arg1 : i32, i32
  }
  func.func @transform_1(%arg0: i32, %arg1: i32) -> (i32, i32) {
    %c0_i32 = arith.constant 0 : i32
    %c0_i32_0 = arith.constant 0 : i32
    return %c0_i32, %arg1 : i32, i32
  }
  func.func @transform_2(%arg0: i32, %arg1: i32) -> (i32, i32) {
    %c0_i32 = arith.constant 0 : i32
    %c0_i32_0 = arith.constant 0 : i32
    %c0_i32_1 = arith.constant 0 : i32
    return %c0_i32, %c0_i32_0 : i32, i32
  }
  func.func @transform_3(%arg0: i32, %arg1: i32) -> (i32, i32) {
    %c0_i32 = arith.constant 0 : i32
    %c0_i32_0 = arith.constant 0 : i32
    return %arg0, %c0_i32 : i32, i32
  }
}

</mosaic_0001>

<bundles_post_ra>
// kernel: tpu_custom_call.1
= control target key start
LH: loop header
LB: loop body
LE: loop exit
PB: predicated region body
PF: predicated region fallthrough
CT: control target
= control target key end

     0   :  { %8 = vsyncpa [#allocation4], 0  ;;  %s650_s0 = inlined_call_operand.hbm [shape: f32[16,1152], index: 0, kind: input, shape index: {}]   ;;  %s651_s1 = inlined_call_operand.hbm [shape: f32[8,1152], index: 1, kind: input, shape index: {}]   ;;  %s652_s2 = inlined_call_operand.vmem [shape: f32[1,8], index: 2, kind: input, shape index: {}]   ;;  %s653_s3 = inlined_call_operand.vmem [shape: f32[16,8], index: 3, kind: output, shape index: {}]  }
   0x1   :  { %9 = vsyncpa [#allocation6], 0  ;;  %s582_s12 = smov [#allocation3]   ;;  %s534_s16 = scalar_lea.hbm %s650_s0, 2304 }
   0x2   :  { %s15_s13 = sshll.u32 %s582_s12, 4  ;;  %p535_p0 = scmp.ne.s32.totalorder %s650_s0, %s534_s16  ;;  %s16_s13 = int_to_ptr.vmem [resolvable:$true] %s15_s13 }
   0x3   :  { %p538_p1 = scmp.lt.u32.totalorder %s534_s16, %s650_s0 }
   0x5   :  { %p540_p2 = pnand %p538_p1, %p535_p0 }
   0x7   :  { %543 = shalt.err (!%p540_p2)
}
   0x8   :  { %s544_s21 = scalar_lea.vmem %s16_s13, 2304  ;;  %p549_p4 = scmp.lt.s32.totalorder %s16_s13, %s16_s13 }
   0x9   :  { %p545_p3 = scmp.ne.s32.totalorder %s16_s13, %s544_s21  ;;  %p550_p5 = scmp.lt.s32.totalorder %s544_s21, %s544_s21 }
   0xb   :  { %p551_p6 = por %p550_p5, %p549_p4 }
   0xd   :  { %p552_p7 = pnand %p551_p6, %p545_p3 }
   0xf   :  { %555 = shalt.err (!%p552_p7)
}
  0x10   :  { %s583_s22 = smov 1152   ;;  %s584_s23 = smov 72  }
  0x11   :  { %21 = dma.hbm_to_vmem [thread:$0]  %s650_s0, 2304, %s16_s13, [#allocation4], %s583_s22, %s583_s22, %s584_s23  }
  0x12   :  { %s585_s26 = smov [#allocation5]   ;;  %s556_s30 = scalar_lea.hbm %s651_s1, 1152 }
  0x13   :  { %s28_s27 = sshll.u32 %s585_s26, 4  ;;  %p557_p8 = scmp.ne.s32.totalorder %s651_s1, %s556_s30  ;;  %s29_s27 = int_to_ptr.vmem [resolvable:$true] %s28_s27 }
  0x14   :  { %p560_p9 = scmp.lt.u32.totalorder %s556_s30, %s651_s1 }
  0x16   :  { %p562_p10 = pnand %p560_p9, %p557_p8 }
  0x18   :  { %565 = shalt.err (!%p562_p10)
}
  0x19   :  { %s566_s8 = scalar_lea.vmem %s29_s27, 1152  ;;  %p571_p12 = scmp.lt.s32.totalorder %s29_s27, %s29_s27 }
  0x1a   :  { %p567_p11 = scmp.ne.s32.totalorder %s29_s27, %s566_s8  ;;  %p572_p13 = scmp.lt.s32.totalorder %s566_s8, %s566_s8 }
  0x1c   :  { %p573_p0 = por %p572_p13, %p571_p12 }
  0x1e   :  { %p574_p1 = pnand %p573_p0, %p567_p11 }
  0x20   :  { %577 = shalt.err (!%p574_p1)
}
  0x21   :  { %31 = dma.hbm_to_vmem [thread:$0]  %s651_s1, 1152, %s29_s27, [#allocation6]  }
  0x22   :  { %578 = dma.done.wait [#allocation4], 2304  }
  0x23   :  { %579 = vsyncadd [#allocation4], 4294964992 }
  0x24   :  { %580 = dma.done.wait [#allocation6], 1152  }
  0x25   :  { %581 = vsyncadd [#allocation6], 4294966144  ;;  %v68_v0 = vld [vmem:[#allocation5 + $0x8] sm:$0xff]  ;;  %v67_v2 = vld [vmem:[#allocation5] sm:$0xff]  ;;  %vm44_vm0 = vcmask 64512   ;;  %v586_v27 = vmov 0.0  }
  0x26   :  { %v72_v1 = vld [vmem:[#allocation5 + $0x28] sm:$0xff]  ;;  %76 = vmatprep.subr.mxu1 %v68_v0  ;;  %v71_v3 = vld [vmem:[#allocation5 + $0x20] sm:$0xff]  ;;  %v50_v4 = vld [vmem:[#allocation3 + $0x8] sm:$0xff]  ;;  %46 = vst.msk [vmem:[#allocation2 + $0x8] sm:$0xff] %vm44_vm0, %v586_v27 }
  0x27   :  { %226 = vmatprep.subr.mxu0 %v72_v1  ;;  %v54_v5 = vld [vmem:[#allocation3 + $0x28] sm:$0xff]  ;;  %77 = vmatpush1.xpose.msra.mxu1 %v67_v2  ;;  %v49_v6 = vld [vmem:[#allocation3] sm:$0xff]  ;;  %v59_v10 = vld [vmem:[#allocation3 + $0x50] sm:$0xff]  ;;  %45 = vst.msk [vmem:[#allocation2] sm:$0xff] %vm44_vm0, %v586_v27 }
  0x28   :  { %227 = vmatpush1.xpose.msra.mxu0 %v71_v3  ;;  %v70_v7 = vld [vmem:[#allocation5 + $0x18] sm:$0xff]  ;;  %v53_v8 = vld [vmem:[#allocation3 + $0x20] sm:$0xff]  ;;  %140 = vmatprep.mubr.f32.mxu1 %v50_v4  ;;  %v63_v11 = vld [vmem:[#allocation3 + $0x70] sm:$0xff] }
  0x29   :  { %290 = vmatprep.mubr.f32.mxu0 %v54_v5  ;;  %v69_v9 = vld [vmem:[#allocation5 + $0x10] sm:$0xff]  ;;  %151 = vmatprep.subr.mxu1 %v70_v7  ;;  %v74_v12 = vld [vmem:[#allocation5 + $0x38] sm:$0xff]  ;;  %v75_v16 = vld [vmem:[#allocation5 + $0x40] sm:$0xff] }
  0x2a   :  { %141 = vmatmul.mubr.f32.vlgmr.msra.gmra.mrb[0].mxu1 %v49_v6  ;;  %v73_v13 = vld [vmem:[#allocation5 + $0x30] sm:$0xff]  ;;  %v58_v14 = vld [vmem:[#allocation3 + $0x48] sm:$0xff]  ;;  %301 = vmatprep.subr.mxu0 %v74_v12  ;;  %v52_v17 = vld [vmem:[#allocation3 + $0x18] sm:$0xff] }
  0x2b   :  { %291 = vmatmul.mubr.f32.vlgmr.msra.gmra.mrb[0].mxu0 %v53_v8  ;;  %152 = vmatpush1.xpose.msra.mxu1 %v69_v9  ;;  %v62_v15 = vld [vmem:[#allocation3 + $0x68] sm:$0xff]  ;;  %v56_v18 = vld [vmem:[#allocation3 + $0x38] sm:$0xff]  ;;  %v51_v19 = vld [vmem:[#allocation3 + $0x10] sm:$0xff] }
  0x2c   :  { %145 = vmatprep.mubr.f32.mxu1 %v59_v10  ;;  %295 = vmatprep.mubr.f32.mxu0 %v63_v11  ;;  %v55_v20 = vld [vmem:[#allocation3 + $0x30] sm:$0xff]  ;;  %v61_v21 = vld [vmem:[#allocation3 + $0x60] sm:$0xff]  ;;  %v60_v23 = vld [vmem:[#allocation3 + $0x58] sm:$0xff] }
  0x2d   :  { %302 = vmatpush1.xpose.msra.mxu0 %v73_v13  ;;  %506 = vmatprep.subr.mxu1 %v75_v16  ;;  %v65_v22 = vld [vmem:[#allocation3 + $0x80] sm:$0xff]  ;;  %v64_v24 = vld [vmem:[#allocation3 + $0x78] sm:$0xff]  ;;  %v66_v26 = vld [vmem:[#allocation3 + $0x88] sm:$0xff] }
  0x2e   :  { %146 = vmatmul.mubr.f32.gmra.mrb[2].mxu1 %v58_v14  ;;  %v57_v25 = vld [vmem:[#allocation3 + $0x40] sm:$0xff]  ;;  %v48_v38 = vld [vmem:[#allocation2 + $0x8] sm:$0xff]  ;;  %v47_v41 = vld [vmem:[#allocation2] sm:$0xff] }
  0x2f   :  { %296 = vmatmul.mubr.f32.gmra.mrb[2].mxu0 %v62_v15  ;;  %215 = vmatprep.mubr.f32.mxu1 %v52_v17  ;;  %v502_v46 = vld [vmem:[%s652_s2] ss:$0 sm:$0xff] }
  0x30   :  { %365 = vmatprep.mubr.f32.mxu0 %v56_v18 }
  0x32   :  { %216 = vmatmul.mubr.f32.vlgmr.msra.gmra.mrb[0].mxu1 %v51_v19 }
  0x33   :  { %366 = vmatmul.mubr.f32.vlgmr.msra.gmra.mrb[0].mxu0 %v55_v20  ;;  %507 = vmatpush3.xpose.msra.mxu1 %v75_v16 }
  0x34   :  { %220 = vmatprep.mubr.f32.mxu1 %v61_v21  ;;  %370 = vmatprep.mubr.f32.mxu0 %v65_v22 }
  0x36   :  { %221 = vmatmul.mubr.f32.gmra.mrb[2].mxu1 %v60_v23 }
  0x37   :  { %371 = vmatmul.mubr.f32.gmra.mrb[2].mxu0 %v64_v24  ;;  %508 = vmatprep.mubr.f32.mxu1 %v57_v25 }
  0x3a   :  { %509 = vmatmul.mubr.f32.vlgmr.msra.gmra.mrb[4].mxu1 %v66_v26 }
 0x105   :  { %v217_v28 = vpop.f32.mrb[0].mxu1 }
 0x106   :  { %v367_v29 = vpop.f32.mrb[0].mxu0  ;;  %v219_v31 = vpop.f32.mrb[1].mxu1 }
 0x107   :  { %v511_v30 = vadd.f32 %v367_v29, %v217_v28  ;;  %v369_v32 = vpop.f32.mrb[1].mxu0 }
 0x109   :  { %v222_v33 = vpop.f32.mrb[2].mxu1 }
 0x10a   :  { %v372_v34 = vpop.f32.mrb[2].mxu0  ;;  %v224_v36 = vpop.f32.mrb[3].mxu1 }
 0x10b   :  { %v512_v35 = vadd.f32 %v372_v34, %v222_v33  ;;  %v374_v37 = vpop.f32.mrb[3].mxu0 }
 0x10d   :  { %v510_v39 = vpop.f32.mrb[4].mxu1 }
 0x10e   :  { %v448_v40 = vadd.f32 %v512_v35, %v510_v39  ;;  %v442_v42 = vpop.f32.mrb[5].mxu1 }
 0x10f   :  { %v443_v43 = vadd.f32 %v511_v30, %v442_v42 }
 0x110   :  { %v452_v44 = vadd.f32 %v448_v40, %v48_v38 }
 0x111   :  { %v451_v45 = vadd.f32 %v443_v43, %v47_v41 }
 0x112   :  { %455 = vst.msk [vmem:[#allocation2 + $0x8] sm:$0xff] %vm44_vm0, %v452_v44 }
 0x113   :  { %454 = vst.msk [vmem:[#allocation2] sm:$0xff] %vm44_vm0, %v451_v45 }
 0x119   :  { %v460_v48 = vld [vmem:[#allocation2 + $0x8] sm:$0xff] }
 0x11a   :  { %v459_v47 = vld [vmem:[#allocation2] sm:$0xff]  ;;  %v469_v51 = vadd.f32 %v502_v46, %v460_v48 }
 0x11b   :  { %v468_v49 = vadd.f32 %v502_v46, %v459_v47 }
 0x11c   :  { %v473_v52 = vsel %vm44_vm0, %v469_v51, -inf }
 0x11d   :  { %v470_v50 = vsel %vm44_vm0, %v468_v49, -inf }
 0x11e   :  { %471 = vmax.xlane.f32.xlu0 %v470_v50 }
 0x122   :  { %474 = vmax.xlane.f32.xlu0 %v473_v52 }
 0x1ab   :  { %v472_v53 = vpop.xlane.xlu0 %471 }
 0x1ac   :  { %v476_v54 = vsub.f32 %v468_v49, %v472_v53 }
 0x1ae   :  { %v478_v55 = vmul.f32 1.442695, %v476_v54 }
 0x1af   :  { %v475_v56 = vpop.xlane.xlu0 %474 }
 0x1b0   :  { %526 = vpow2.f32 %v478_v55  ;;  %v477_v57 = vsub.f32 %v469_v51, %v475_v56 }
 0x1b2   :  { %v480_v58 = vmul.f32 1.442695, %v477_v57 }
 0x1b4   :  { %528 = vpow2.f32 %v480_v58 }
 0x1ba   :  { %v527_v59 = vpop.eup %526 }
 0x1bb   :  { %v482_v60 = vsel %vm44_vm0, %v527_v59, 0.0 }
 0x1bc   :  { %483 = vadd.xlane.f32.xlu1 %v482_v60 }
 0x1be   :  { %v529_v61 = vpop.eup %528 }
 0x1bf   :  { %v485_v62 = vsel %vm44_vm0, %v529_v61, 0.0 }
 0x1c0   :  { %486 = vadd.xlane.f32.xlu1 %v485_v62 }
 0x249   :  { %v484_v63 = vpop.xlane.xlu1 %483 }
 0x24a   :  { %530 = vlog2.f32 %v484_v63 }
 0x24d   :  { %v487_v0 = vpop.xlane.xlu1 %486 }
 0x24e   :  { %532 = vlog2.f32 %v487_v0 }
 0x254   :  { %v531_v1 = vpop.eup %530 }
 0x255   :  { %v489_v2 = vmul.f32 0.6931472, %v531_v1 }
 0x257   :  { %v492_v3 = vsub.f32 %v476_v54, %v489_v2 }
 0x258   :  { %v533_v4 = vpop.eup %532 }
 0x259   :  { %494 = vst.msk [vmem:[%s653_s3] sm:$0xff] %vm44_vm0, %v492_v3  ;;  %v491_v5 = vmul.f32 0.6931472, %v533_v4 }
 0x25b   :  { %v493_v6 = vsub.f32 %v477_v57, %v491_v5 }
 0x25d   :  { %495 = vst.msk [vmem:[%s653_s3 + $0x8] sm:$0xff] %vm44_vm0, %v493_v6 }
 0x25e   :  { %500 = vsyncpa [#allocation4], 1 }
 0x25f   :  { %501 = vsyncpa [#allocation6], 1 }

</bundles_post_ra>
